<compile_context>
chip_gen: v7x
topology: tpu7x:2x2x1
jax: 0.10.0
libtpu: 0.0.40
codegen_flags: <defaults>
</compile_context>

<pallas_src>
import jax
import jax.numpy as jnp
from jax.experimental import pallas as pl
from jax.experimental.pallas import tpu as pltpu


def _gelu_exact(x):
    # Matches torch.nn.functional.gelu default (erf-based, exact).
    return 0.5 * x * (1.0 + jax.lax.erf(x * (1.0 / jnp.sqrt(2.0))))


# ----------------------------- kernels ---------------------------------------

def ffn_kernel_resident(x_ref, w1_ref, w2_ref, o_ref):
    # Weights fully resident in VMEM (constant index_map => fetched once).
    h = jnp.dot(x_ref[...], w1_ref[...], preferred_element_type=jnp.float32)
    h = _gelu_exact(h)
    o_ref[...] = jnp.dot(h.astype(w2_ref.dtype), w2_ref[...],
                         preferred_element_type=jnp.float32).astype(o_ref.dtype)


def ffn_kernel_stream_f32out(x_ref, w1_ref, w2_ref, o_ref):
    # d_ff streamed on the last ("arbitrary") grid axis; accumulate directly
    # into the resident f32 output block (out index_map constant in kf).
    kf = pl.program_id(1)

    @pl.when(kf == 0)
    def _():
        o_ref[...] = jnp.zeros_like(o_ref)

    h = jnp.dot(x_ref[...], w1_ref[...], preferred_element_type=jnp.float32)
    h = _gelu_exact(h)
    o_ref[...] += jnp.dot(h.astype(w2_ref.dtype), w2_ref[...],
                          preferred_element_type=jnp.float32)


def ffn_kernel_stream(x_ref, w1_ref, w2_ref, o_ref, acc_ref):
    # d_ff streamed with an f32 VMEM accumulator (non-f32 outputs).
    kf = pl.program_id(1)

    @pl.when(kf == 0)
    def _():
        acc_ref[...] = jnp.zeros_like(acc_ref)

    h = jnp.dot(x_ref[...], w1_ref[...], preferred_element_type=jnp.float32)
    h = _gelu_exact(h)
    acc_ref[...] += jnp.dot(h.astype(w2_ref.dtype), w2_ref[...],
                            preferred_element_type=jnp.float32)

    @pl.when(kf == pl.num_programs(1) - 1)
    def _():
        o_ref[...] = acc_ref[...].astype(o_ref.dtype)


# --------------------------- tile planning -----------------------------------

def _round_up(x, m):
    return (x + m - 1) // m * m


def _vmem_budget_bytes():
    """~75% of this generation's per-core VMEM (v5e/v6e 128 MiB, v7x 64 MiB)."""
    try:
        cap = int(pltpu.get_tpu_info().vmem_capacity_bytes)
    except Exception:
        cap = 64 * 1024 * 1024  # conservative floor: v7x per-TensorCore VMEM
    return (cap * 3) // 4       # headroom for Mosaic internals / semaphores


def _pick_tm(m, desired):
    """Token-tile size: multiple of 8, <= desired, minimizing dead M padding."""
    m8 = _round_up(max(m, 1), 8)
    desired = max(8, (desired // 8) * 8)
    if m8 <= desired:
        return m8
    best_tm, best_rows = desired, _round_up(m8, desired)
    lo = max(8, desired // 2)
    for tm in range(desired - 8, lo - 1, -8):
        rows = _round_up(m8, tm)
        if rows < best_rows:
            best_tm, best_rows = tm, rows
    return best_tm


# ------------------------------ wrapper ---------------------------------------

def ffn_pallas(x, w1_t, w2_t, *, tm_desired=512, tf_desired=1024):
    """x: [..., d_model]; w1_t: [d_model, d_ff] (= w1.weight.T); w2_t: [d_ff, d_model]."""
    d_model = x.shape[-1]
    d_ff = w1_t.shape[-1]
    assert w1_t.shape == (d_model, d_ff)
    assert w2_t.shape == (d_ff, d_model)

    lead = x.shape[:-1]
    x2d = x.reshape(-1, d_model)
    M = x2d.shape[0]

    out_dtype = x.dtype
    bx = jnp.dtype(x.dtype).itemsize
    bw = jnp.dtype(w1_t.dtype).itemsize
    bo = jnp.dtype(out_dtype).itemsize
    acc_in_out = jnp.dtype(out_dtype) == jnp.dtype(jnp.float32)

    budget = _vmem_budget_bytes()

    # Lane-dense / MXU-aligned padding (gelu(0) == 0, padded W rows/cols are
    # zero, padded token rows are sliced off -> padding is semantically exact).
    dm_align = 256 if d_model >= 256 else 128
    d_model_p = _round_up(d_model, dm_align)
    d_ff_128 = _round_up(d_ff, 128)

    tm = _pick_tm(M, tm_desired)

    # ---- mode selection: resident weights vs streamed d_ff ------------------
    def resident_need(tm_):
        return (2 * tm_ * d_model_p * bx            # x tiles (double-buffered)
                + 2 * d_model_p * d_ff_128 * bw     # W1 (conservative 2x)
                + 2 * d_ff_128 * d_model_p * bw     # W2 (conservative 2x)
                + 2 * tm_ * d_model_p * bo          # out tiles
                + tm_ * d_ff_128 * 4                # gelu intermediate (f32)
                + tm_ * d_model_p * 4)              # misc f32 temporaries

    use_resident = resident_need(tm) <= budget
    if not use_resident and tm > 64:
        # A smaller token tile that keeps the weights resident beats
        # re-streaming them from HBM once per M tile.
        tm_small = max(64, ((tm // 2 + 7) // 8) * 8)
        if resident_need(tm_small) <= budget:
            tm, use_resident = tm_small, True

    if use_resident:
        d_ff_p = d_ff_128
        M_p = _round_up(M, tm)
        n_m = M_p // tm
        # Megacore: with one token tile the second TensorCore (v7x) would idle;
        # split it (weights stay resident, so the extra step is ~free elsewhere).
        if n_m == 1 and tm > 8:
            tm = max(8, (((tm + 1) // 2 + 7) // 8) * 8)
            M_p = _round_up(M, tm)
            n_m = M_p // tm

        grid = (n_m,)
        in_specs = [
            pl.BlockSpec((tm, d_model_p), lambda i: (i, 0)),
            pl.BlockSpec((d_model_p, d_ff_p), lambda i: (0, 0)),
            pl.BlockSpec((d_ff_p, d_model_p), lambda i: (0, 0)),
        ]
        out_specs = pl.BlockSpec((tm, d_model_p), lambda i: (i, 0))
        scratch_shapes = []
        kernel = ffn_kernel_resident
        dim_sem = ("parallel",)
    else:
        # Streamed d_ff: largest lane-aligned tf that fits the VMEM budget.
        def tf_fit(tm_):
            acc_bytes = 0 if acc_in_out else tm_ * d_model_p * 4
            fixed = (2 * tm_ * d_model_p * bx       # x tiles
                     + 2 * tm_ * d_model_p * bo     # out tiles
                     + acc_bytes                    # accumulator (if any)
                     + tm_ * d_model_p * 4)         # misc f32 temporaries
            per_tf = 4 * d_model_p * bw + 4 * tm_   # W1+W2 double-buffered + h
            return (budget - fixed) // per_tf

        tf = (tf_fit(tm) // 128) * 128
        while tf < 256 and tm > 64:
            tm = max(64, ((tm // 2 + 7) // 8) * 8)
            tf = (tf_fit(tm) // 128) * 128
        tf = max(128, min(tf, (tf_desired // 128) * 128, d_ff_128))

        # Pad d_ff UP to the tile (never shrink tf for awkward factors).
        d_ff_p = _round_up(d_ff, tf)
        M_p = _round_up(M, tm)
        grid = (M_p // tm, d_ff_p // tf)
        in_specs = [
            pl.BlockSpec((tm, d_model_p), lambda i, kf: (i, 0)),
            pl.BlockSpec((d_model_p, tf), lambda i, kf: (0, kf)),
            pl.BlockSpec((tf, d_model_p), lambda i, kf: (kf, 0)),
        ]
        out_specs = pl.BlockSpec((tm, d_model_p), lambda i, kf: (i, 0))
        if acc_in_out:
            scratch_shapes = []
            kernel = ffn_kernel_stream_f32out
        else:
            scratch_shapes = [pltpu.VMEM((tm, d_model_p), jnp.float32)]
            kernel = ffn_kernel_stream
        dim_sem = ("parallel", "arbitrary")

    # Zero-padding (exact: gelu(0)=0, padded weight rows/cols are zero).
    xp = x2d
    if (M_p, d_model_p) != (M, d_model):
        xp = jnp.pad(x2d, ((0, M_p - M), (0, d_model_p - d_model)))
    w1p = w1_t
    if (d_model_p, d_ff_p) != (d_model, d_ff):
        w1p = jnp.pad(w1_t, ((0, d_model_p - d_model), (0, d_ff_p - d_ff)))
    w2p = w2_t
    if (d_ff_p, d_model_p) != (d_ff, d_model):
        w2p = jnp.pad(w2_t, ((0, d_ff_p - d_ff), (0, d_model_p - d_model)))

    out2d = pl.pallas_call(
        kernel,
        out_shape=jax.ShapeDtypeStruct((M_p, d_model_p), out_dtype),
        grid_spec=pltpu.PrefetchScalarGridSpec(
            num_scalar_prefetch=0,
            grid=grid,
            in_specs=in_specs,
            out_specs=out_specs,
            scratch_shapes=scratch_shapes,
        ),
        compiler_params=pltpu.CompilerParams(
            dimension_semantics=dim_sem,
            vmem_limit_bytes=int(budget),
        ),
    )(xp, w1p, w2p)

    out2d = out2d[:M, :d_model]
    return out2d.reshape(*lead, d_model)


def ffn_reference(x, w1_t, w2_t):
    h = jnp.einsum("...d,df->...f", x.astype(jnp.float32),
                   w1_t.astype(jnp.float32))
    h = _gelu_exact(h)
    return jnp.einsum("...f,fd->...d", h,
                      w2_t.astype(jnp.float32)).astype(x.dtype)


if __name__ == "__main__":
    d_model, d_ff = 32, 64
    batch, seq = 2, 8

    key = jax.random.PRNGKey(0)
    kx, k1, k2 = jax.random.split(key, 3)

    # PyTorch stores w1.weight as (d_ff, d_model), w2.weight as (d_model, d_ff).
    # Transpose to (in, out) so the kernel does row-major matmuls on the MXU.
    w1_weight = jax.random.normal(k1, (d_ff, d_model), jnp.float32) * 0.05
    w2_weight = jax.random.normal(k2, (d_model, d_ff), jnp.float32) * 0.05
    w1_t = w1_weight.T  # (d_model, d_ff)
    w2_t = w2_weight.T  # (d_ff, d_model)

    x = jax.random.normal(kx, (batch, seq, d_model), jnp.float32)

    out = jax.block_until_ready(ffn_pallas(x, w1_t, w2_t))
    ref = ffn_reference(x, w1_t, w2_t)

    assert out.shape == (batch, seq, d_model)
    assert jnp.allclose(out, ref, atol=1e-5, rtol=1e-5), "mismatch vs reference"

    print("KERNEL_OK")
</pallas_src>

<mosaic_0001>
module attributes {stable_mosaic.version = 11 : i64} {
  func.func @ffn_kernel_resident(%arg0: i32, %arg1: memref<8x128xf32, #tpu.memory_space<vmem>>, %arg2: memref<128x128xf32, #tpu.memory_space<vmem>>, %arg3: memref<128x128xf32, #tpu.memory_space<vmem>>, %arg4: memref<8x128xf32, #tpu.memory_space<vmem>>) attributes {dimension_semantics = [#tpu.dimension_semantics<parallel>], iteration_bounds = array<i64: 2>, scalar_prefetch = 0 : i64, scratch_operands = 0 : i64, tpu.core_type = #tpu.core_type<tc>, window_params = [{transform_indices = @transform_0, window_bounds = array<i64: 8, 128>}, {pipeline_mode = #tpu.pipeline_mode<synchronous>, transform_indices = @transform_1, window_bounds = array<i64: 128, 128>}, {pipeline_mode = #tpu.pipeline_mode<synchronous>, transform_indices = @transform_2, window_bounds = array<i64: 128, 128>}, {transform_indices = @transform_3, window_bounds = array<i64: 8, 128>}]} {
    %c0 = arith.constant 0 : index
    %c0_0 = arith.constant 0 : index
    %0 = vector.load %arg1[%c0, %c0_0] : memref<8x128xf32, #tpu.memory_space<vmem>>, vector<8x128xf32>
    %c0_1 = arith.constant 0 : index
    %c0_2 = arith.constant 0 : index
    %1 = vector.load %arg2[%c0_1, %c0_2] : memref<128x128xf32, #tpu.memory_space<vmem>>, vector<128x128xf32>
    %cst = arith.constant dense<0.000000e+00> : vector<8x128xf32>
    %2 = tpu.matmul %0, %1, %cst {dimension_numbers = #tpu.dot_dimension_numbers<[1], [0], [0], [1], [0, 0, 1, 1], [], []>} : vector<8x128xf32>, vector<128x128xf32>, vector<8x128xf32> -> vector<8x128xf32>
    %cst_3 = arith.constant 5.000000e-01 : f32
    %3 = vector.broadcast %cst_3 : f32 to vector<8x128xf32>
    %4 = arith.mulf %3, %2 : vector<8x128xf32>
    %cst_4 = arith.constant 2.000000e+00 : f32
    %5 = math.sqrt %cst_4 : f32
    %cst_5 = arith.constant 1.000000e+00 : f32
    %6 = arith.divf %cst_5, %5 : f32
    %7 = vector.broadcast %6 : f32 to vector<8x128xf32>
    %8 = arith.mulf %2, %7 : vector<8x128xf32>
    %9 = math.erf %8 : vector<8x128xf32>
    %cst_6 = arith.constant 1.000000e+00 : f32
    %10 = vector.broadcast %cst_6 : f32 to vector<8x128xf32>
    %11 = arith.addf %10, %9 : vector<8x128xf32>
    %12 = arith.mulf %4, %11 : vector<8x128xf32>
    %c0_7 = arith.constant 0 : index
    %c0_8 = arith.constant 0 : index
    %13 = vector.load %arg3[%c0_7, %c0_8] : memref<128x128xf32, #tpu.memory_space<vmem>>, vector<128x128xf32>
    %cst_9 = arith.constant dense<0.000000e+00> : vector<8x128xf32>
    %14 = tpu.matmul %12, %13, %cst_9 {dimension_numbers = #tpu.dot_dimension_numbers<[1], [0], [0], [1], [0, 0, 1, 1], [], []>} : vector<8x128xf32>, vector<128x128xf32>, vector<8x128xf32> -> vector<8x128xf32>
    %c0_10 = arith.constant 0 : index
    %c0_11 = arith.constant 0 : index
    %15 = vector.load %arg4[%c0_10, %c0_11] : memref<8x128xf32, #tpu.memory_space<vmem>>, vector<8x128xf32>
    tpu.vector_store %arg4[%c0_10, %c0_11], %14 {strides = array<i32>} : memref<8x128xf32, #tpu.memory_space<vmem>>, vector<8x128xf32>,
    return
  }
  func.func @transform_0(%arg0: i32) -> (i32, i32) {
    %c0_i32 = arith.constant 0 : i32
    %c0_i32_0 = arith.constant 0 : i32
    return %arg0, %c0_i32 : i32, i32
  }
  func.func @transform_1(%arg0: i32) -> (i32, i32) {
    %c0_i32 = arith.constant 0 : i32
    %c0_i32_0 = arith.constant 0 : i32
    %c0_i32_1 = arith.constant 0 : i32
    return %c0_i32, %c0_i32_0 : i32, i32
  }
  func.func @transform_2(%arg0: i32) -> (i32, i32) {
    %c0_i32 = arith.constant 0 : i32
    %c0_i32_0 = arith.constant 0 : i32
    %c0_i32_1 = arith.constant 0 : i32
    return %c0_i32, %c0_i32_0 : i32, i32
  }
  func.func @transform_3(%arg0: i32) -> (i32, i32) {
    %c0_i32 = arith.constant 0 : i32
    %c0_i32_0 = arith.constant 0 : i32
    return %arg0, %c0_i32 : i32, i32
  }
}

</mosaic_0001>

<bundles_post_ra>
// kernel: tpu_custom_call.1
= control target key start
LH: loop header
LB: loop body
LE: loop exit
PB: predicated region body
PF: predicated region fallthrough
CT: control target
= control target key end

     0   :  { %8 = vsyncpa [#allocation3], 0  ;;  %s1178_s0 = inlined_call_operand.hbm [shape: f32[16,128], index: 0, kind: input, shape index: {}]   ;;  %s1179_s1 = inlined_call_operand.hbm [shape: f32[128,128], index: 1, kind: input, shape index: {}]   ;;  %s1180_s2 = inlined_call_operand.hbm [shape: f32[128,128], index: 2, kind: input, shape index: {}]   ;;  %s1181_s3 = inlined_call_operand.hbm [shape: f32[16,128], index: 3, kind: output, shape index: {}]  }
   0x1   :  { %10 = vsyncpa [#allocation3 + $0x1], 0 }
   0x2   :  { %11 = vsyncpa [#allocation6], 0 }
   0x3   :  { %12 = vsyncpa [#allocation4], 0 }
   0x4   :  { %14 = vsyncpa [#allocation4 + $0x1], 0  ;;  %s926_s12 = smov 0   ;;  %s928_s13 = smov 0  }
   0x5   :  { %s930_s14 = smov 0   ;;  %s932_s15 = smov 0  }
   0x6 LB: > { %s947_s16 = sadd.s32 4294967295, %s895_s15   ;;  %s497_s17 = sadd.s32 4294967294, %s895_s15   ;;  %s895_s15 = sphi %s932_s15, %s1201_s15   ;;  %s891_s14 = sphi %s930_s14, %s1200_s14   ;;  %s887_s13 = sphi %s928_s13, %s1199_s13   ;;  %s883_s12 = sphi %s926_s12, %s1198_s12  }
   0x7   : > { %p40_p0 = scmp.ne.s32.totalorder %s887_s13, %s883_s12  ;;  %p1182_p1 = scmp.eq.s32.totalorder %s947_s16, 0 }
   0x8   : > { %p112_p3 = scmp.eq.s32.totalorder %s497_s17, 1  ;;  %p498_p5 = scmp.ge.s32.totalorder %s895_s15, 1 }
   0x9   : > { %p956_p4 = por %p1182_p1, %p40_p0  ;;  %p119_p7 = scmp.lt.s32.totalorder %s895_s15, 3 }
   0xa   : > { %p961_p6 = por %p112_p3, %p40_p0  ;;  %s897_s21 = smov [#allocation5]  }
   0xb   : > { %s1185_s18 = scalar_select %p956_p4, 1, 0 }
   0xc   : > { %s1186_s19 = scalar_select %p961_p6, 1, 0 }
   0xd   : > { %p966_p8 = pnand %p498_p5, %p119_p7  ;;  %s131_s22 = sshll.u32 %s897_s21, 4  ;;  %s970_s22 = int_to_ptr.vmem [resolvable:$true] %s131_s22 }
   0xe   : > { %s898_s24 = smov [#allocation7]   ;;  %s739_s28 = scalar_lea.hbm %s1179_s1, 2048 }
   0xf   : > { %p677_p9 = pneg %p966_p8  ;;  %s144_s25 = sshll.u32 %s898_s24, 4  ;;  %s981_s25 = int_to_ptr.vmem [resolvable:$true] %s144_s25 }
  0x10   : > { %p740_p12 = scmp.ne.s32.totalorder %s1179_s1, %s739_s28  ;;  %p746_p5 = scmp.lt.u32.totalorder %s739_s28, %s1179_s1 }
  0x11   : > { %p977_p11 = pnand %p677_p9, %p1182_p1 }
  0x13   : > { %p741_p13 = pneg %p977_p11 }
  0x15   : > { %p742_p0 = pnand %p741_p13, %p740_p12 }
  0x17   : > { %p743_p3 = pneg %p742_p0 }
  0x19   : > { %p748_p7 = pnand %p746_p5, %p743_p3 }
  0x1b   : > { %751 = shalt.err (!%p748_p7)
}
  0x1c   : > { %s752_s6 = scalar_lea.vmem %s970_s22, 2048  ;;  %p760_p2 = scmp.lt.s32.totalorder %s970_s22, %s970_s22 }
  0x1d   : > { %p753_p9 = scmp.ne.s32.totalorder %s970_s22, %s752_s6  ;;  %p761_p12 = scmp.lt.s32.totalorder %s752_s6, %s752_s6 }
  0x1f   : > { %p755_p10 = pnand %p753_p9, %p741_p13  ;;  %p762_p0 = por %p761_p12, %p760_p2 }
  0x21   : > { %p756_p1 = pneg %p755_p10 }
  0x23   : > { %p763_p6 = pnand %p762_p0, %p756_p1 }
  0x25   : > { %766 = shalt.err (!%p763_p6)
}
  0x26   : > { %s899_s7 = smov 128   ;;  %s900_s8 = smov 8  }
  0x27   : > { %680 = dma.hbm_to_vmem [thread:$0]  (!%p977_p11), %s1179_s1, 2048, %s970_s22, [#allocation6], %s899_s7, %s899_s7, %s900_s8  }
  0x28   : > { %s767_s21 = scalar_lea.hbm %s1180_s2, 2048 }
  0x29   : > { %p768_p2 = scmp.ne.s32.totalorder %s1180_s2, %s767_s21  ;;  %p774_p10 = scmp.lt.u32.totalorder %s767_s21, %s1180_s2 }
  0x2b   : > { %p770_p1 = pnand %p768_p2, %p741_p13 }
  0x2d   : > { %p771_p6 = pneg %p770_p1 }
  0x2f   : > { %p776_p3 = pnand %p774_p10, %p771_p6 }
  0x31   : > { %779 = shalt.err (!%p776_p3)
}
  0x32   : > { %s780_s22 = scalar_lea.vmem %s981_s25, 2048  ;;  %p788_p12 = scmp.lt.s32.totalorder %s981_s25, %s981_s25 }
  0x33   : > { %p781_p5 = scmp.ne.s32.totalorder %s981_s25, %s780_s22  ;;  %p789_p0 = scmp.lt.s32.totalorder %s780_s22, %s780_s22 }
  0x35   : > { %p783_p7 = pnand %p781_p5, %p741_p13  ;;  %p790_p2 = por %p789_p0, %p788_p12 }
  0x37   : > { %p784_p9 = pneg %p783_p7 }
  0x39   : > { %p791_p1 = pnand %p790_p2, %p784_p9 }
  0x3b   : > { %794 = shalt.err (!%p791_p1)
}
  0x3c   : > { %683 = dma.hbm_to_vmem [thread:$0]  (!%p977_p11), %s1180_s2, 2048, %s981_s25, [#allocation6], %s899_s7, %s899_s7, %s900_s8  }
  0x3d   : > { %s1036_s4 = sadd.s32 1, %s895_s15   ;;  %s27_s23 = sadd.s32 1, %s891_s14 }
  0x3e   : > { %s24_s5 = ssub.s32 %s895_s15, %s1036_s4  ;;  %p34_p13 = scmp.ne.s32.totalorder %s891_s14, %s887_s13 }
  0x3f   : > { %p25_p6 = scmp.eq.s32.totalorder %s24_s5, 0  ;;  %p35_p10 = scmp.eq.s32.totalorder %s895_s15, 0 }
  0x40   : > { %p1189_p3 = scmp.eq.s32.totalorder %s947_s16, 1  ;;  %p694_p7 = scmp.lt.s32.totalorder %s895_s15, 2 }
  0x41   : > { %s1052_s9 = scalar_select %p25_p6, %s891_s14, %s27_s23  }
  0x42   : > { %p1046_p5 = por %p1189_p3, %p34_p13  ;;  %p36_p9 = por %p35_p10, %p34_p13 }
  0x43   : > { %s158_s10 = sand.u32 1, %s891_s14   ;;  %s503_s25 = sshll.u32 %s895_s15, 7 }
  0x44   : > { %s1190_s6 = scalar_select %p1046_p5, 1, 0 }
  0x45   : > { %s502_s11 = sshll.u32 %s158_s10, 3  ;;  %s1059_s17 = scalar_lea.hbm %s1178_s0, %s503_s25 }
  0x46   : > { %s162_s21 = scalar_lea.vmem [#allocation2], %s502_s11  ;;  %p1063_p11 = pnand %p694_p7, %p36_p9 }
  0x47   : > { %s169_s24 = sshll.u32 %s162_s21, 4  ;;  %s159_s27 = scalar_lea.sflag [#allocation3], %s158_s10  ;;  %s1061_s24 = int_to_ptr.vmem [resolvable:$true] %s169_s24 }
  0x48   : > { %s795_s28 = scalar_lea.hbm %s1059_s17, 128  ;;  %p797_p0 = pneg %p1063_p11 }
  0x49   : > { %p796_p12 = scmp.ne.s32.totalorder %s1059_s17, %s795_s28  ;;  %s800_s30 = scalar_lea.hbm %s1178_s0, 256 }
  0x4a   : > { %p801_p13 = scmp.lt.u32.totalorder %s1059_s17, %s1178_s0  ;;  %p802_p6 = scmp.lt.u32.totalorder %s800_s30, %s795_s28 }
  0x4b   : > { %p798_p2 = pnand %p797_p0, %p796_p12  ;;  %p804_p3 = scmp.lt.u32.totalorder %s795_s28, %s1059_s17 }
  0x4c   : > { %p803_p10 = por %p802_p6, %p801_p13 }
  0x4d   : > { %p799_p1 = pneg %p798_p2 }
  0x4e   : > { %p805_p7 = por %p804_p3, %p803_p10 }
  0x50   : > { %p806_p9 = pnand %p805_p7, %p799_p1 }
  0x52   : > { %809 = shalt.err (!%p806_p9)
}
  0x53   : > { %s810_s10 = scalar_lea.vmem %s1061_s24, 128  ;;  %s901_s11 = smov [#allocation2]  }
  0x54   : > { %p811_p12 = scmp.ne.s32.totalorder %s1061_s24, %s810_s10  ;;  %s815_s25 = sshll.u32 %s901_s11, 4  ;;  %s816_s25 = int_to_ptr.vmem [resolvable:$false] %s815_s25 }
  0x55   : > { %s817_s7 = scalar_lea.vmem %s816_s25, 256  ;;  %p818_p4 = scmp.lt.s32.totalorder %s1061_s24, %s816_s25 }
  0x56   : > { %p813_p2 = pnand %p811_p12, %p797_p0  ;;  %p819_p13 = scmp.lt.s32.totalorder %s817_s7, %s810_s10 }
  0x58   : > { %p814_p5 = pneg %p813_p2  ;;  %p820_p6 = por %p819_p13, %p818_p4 }
  0x5a   : > { %p821_p10 = pnand %p820_p6, %p814_p5 }
  0x5c   : > { %824 = shalt.err (!%p821_p10)
}
  0x5d   : > { %687 = dma.hbm_to_vmem [thread:$0]  (!%p1063_p11), %s1059_s17, 128, %s1061_s24, %s159_s27  }
  0x5e   : > { %178 = sbr.rel (%p966_p8) target bundleno = 594 (0x252), region = 32  ;;  %s1095_s8 = sand.u32 (!%p966_p8), 1, %s887_s13  }
  0x5f   : > { %s505_s21 = sshll.u32 (!%p966_p8), %s1095_s8, 3  ;;  %s181_s28 = scalar_lea.sflag (!%p966_p8), [#allocation3], %s1095_s8 }
  0x60   : > { %s1101_s22 = scalar_lea.vmem (!%p966_p8), [#allocation2], %s505_s21  ;;  %p1192_p4 = scmp.ne.s32.totalorder (!%p966_p8), %s1185_s18, 0 }
  0x65   : > { %870 = dma.done.wait (%p1192_p4), %s181_s28, 128  }
  0x66   : > { %872 = vsyncadd (%p1192_p4), %s181_s28, 4294967168  ;;  %p1193_p5 = scmp.eq.s32.totalorder %s947_s16, 0 }
  0x68   : > { %874 = dma.done.wait (%p1193_p5), [#allocation6], 4096   ;;  %p1194_p8 = pmov %p1193_p5 }
  0x69   : > { %v902_v0 = vmov 0.0|0.0   ;;  %vm903_vm0 = vmmov 0   ;;  %v904_v1 = vmov 0.0   ;;  %v216_v2 = vld [vmem:[#allocation5] sm:$0xff]  ;;  %v217_v3 = vld [vmem:[#allocation5 + $0x8] sm:$0xff]  ;;  %v218_v4 = vld [vmem:[#allocation5 + $0x10] sm:$0xff] }
  0x6a   : > { %876 = vsyncadd (%p1194_p8), [#allocation6], 4294963200  ;;  %617 = vmatprep.subr.bf16.mxu0 %v902_v0  ;;  %579 = vmatprep.mubr.msk.f32.mxu0 %vm903_vm0, %v904_v1  ;;  %v618_v5 = vpack.c.bf16 %v217_v3, %v216_v2  ;;  %v219_v6 = vld [vmem:[#allocation5 + $0x18] sm:$0xff]  ;;  %v220_v8 = vld [vmem:[#allocation5 + $0x20] sm:$0xff]  ;;  %s214_s18 = scalar_lea.vmem [#allocation8], %s505_s21  ;;  %s510_s17 = sshll.u32 %s947_s16, 7 }
  0x6b   : > { %641 = vmatprep.subr.bf16.mxu1 %v902_v0  ;;  %614 = vmatprep.mubr.msk.f32.mxu1 %vm903_vm0, %v904_v1  ;;  %v621_v7 = vpack.c.bf16 %v219_v6, %v218_v4  ;;  %v221_v9 = vld [vmem:[#allocation5 + $0x28] sm:$0xff]  ;;  %v307_v10 = vld [vmem:[#allocation7] sm:$0xff]  ;;  %v309_v12 = vld [vmem:[#allocation7 + $0x10] sm:$0xff]  ;;  %s408_s20 = sshll.u32 %s214_s18, 4  ;;  %s1136_s27 = scalar_lea.hbm %s1181_s3, %s510_s17  ;;  %s1131_s20 = int_to_ptr.vmem [resolvable:$true] %s408_s20 }
  0x6c   : > { %619 = vmatpush3.bf16.msra.mxu0 %v618_v5  ;;  %v308_v11 = vld [vmem:[#allocation7 + $0x8] sm:$0xff]  ;;  %v310_v13 = vld [vmem:[#allocation7 + $0x18] sm:$0xff]  ;;  %v624_v14 = vpack.c.bf16 %v221_v9, %v220_v8  ;;  %v222_v16 = vld [vmem:[#allocation5 + $0x30] sm:$0xff]  ;;  %s395_s29 = scalar_lea.sflag [#allocation4], %s1095_s8  ;;  %s825_s30 = scalar_lea.vmem %s1131_s20, 128 }
  0x6d   : > { %620 = vmatprep.subr.bf16.mxu0 %v902_v0  ;;  %v642_v15 = vpack.c.bf16 %v308_v11, %v307_v10  ;;  %v223_v17 = vld [vmem:[#allocation5 + $0x38] sm:$0xff]  ;;  %v645_v18 = vpack.c.bf16 %v310_v13, %v309_v12  ;;  %v311_v19 = vld [vmem:[#allocation7 + $0x20] sm:$0xff]  ;;  %v312_v20 = vld [vmem:[#allocation7 + $0x28] sm:$0xff]  ;;  %p826_p11 = scmp.ne.s32.totalorder %s1131_s20, %s825_s30  ;;  %p1195_p0 = scmp.ne.s32.totalorder %s1190_s6, 0 }
  0x6e   : > { %v627_v21 = vpack.c.bf16 %v223_v17, %v222_v16  ;;  %v224_v22 = vld [vmem:[#allocation5 + $0x40] sm:$0xff]  ;;  %v225_v23 = vld [vmem:[#allocation5 + $0x48] sm:$0xff]  ;;  %v648_v24 = vpack.c.bf16 %v312_v20, %v311_v19  ;;  %v313_v25 = vld [vmem:[#allocation7 + $0x30] sm:$0xff]  ;;  %s905_s16 = smov [#allocation8]  }
  0x6f   : > { %643 = vmatpush3.bf16.msra.mxu1 %v642_v15  ;;  %v314_v26 = vld [vmem:[#allocation7 + $0x38] sm:$0xff]  ;;  %v630_v27 = vpack.c.bf16 %v225_v23, %v224_v22  ;;  %v226_v28 = vld [vmem:[#allocation5 + $0x50] sm:$0xff]  ;;  %v228_v32 = vld [vmem:[#allocation5 + $0x60] sm:$0xff]  ;;  %p827_p1 = pnand %p826_p11, %p1195_p0  ;;  %s829_s23 = sshll.u32 %s905_s16, 4  ;;  %s830_s23 = int_to_ptr.vmem [resolvable:$false] %s829_s23 }
  0x70   : > { %622 = vmatpush3.bf16.msra.mxu0 %v621_v7  ;;  %644 = vmatprep.subr.bf16.mxu1 %v902_v0  ;;  %v227_v29 = vld [vmem:[#allocation5 + $0x58] sm:$0xff]  ;;  %v651_v30 = vpack.c.bf16 %v314_v26, %v313_v25  ;;  %v229_v33 = vld [vmem:[#allocation5 + $0x68] sm:$0xff]  ;;  %v230_v35 = vld [vmem:[#allocation5 + $0x70] sm:$0xff]  ;;  %s831_s5 = scalar_lea.vmem %s830_s23, 256  ;;  %p832_p7 = scmp.lt.s32.totalorder %s1131_s20, %s830_s23 }
  0x71   : > { %623 = vmatprep.subr.bf16.mxu0 %v902_v0  ;;  %v633_v31 = vpack.c.bf16 %v227_v29, %v226_v28  ;;  %v636_v34 = vpack.c.bf16 %v229_v33, %v228_v32  ;;  %v231_v36 = vld [vmem:[#allocation5 + $0x78] sm:$0xff]  ;;  %v315_v39 = vld [vmem:[#allocation7 + $0x40] sm:$0xff]  ;;  %v316_v40 = vld [vmem:[#allocation7 + $0x48] sm:$0xff]  ;;  %p828_p3 = pneg %p827_p1  ;;  %p833_p9 = scmp.lt.s32.totalorder %s831_s5, %s825_s30 }
  0x72   : > { %v639_v37 = vpack.c.bf16 %v231_v36, %v230_v35  ;;  %v215_v38 = vld [vmem:[%s1101_s22] sm:$0xff]  ;;  %v654_v41 = vpack.c.bf16 %v316_v40, %v315_v39  ;;  %v319_v45 = vld [vmem:[#allocation7 + $0x60] sm:$0xff]  ;;  %v320_v46 = vld [vmem:[#allocation7 + $0x68] sm:$0xff] }
  0x73   : > { %646 = vmatpush3.bf16.msra.mxu1 %v645_v18  ;;  %v317_v42 = vld [vmem:[#allocation7 + $0x50] sm:$0xff]  ;;  %v318_v43 = vld [vmem:[#allocation7 + $0x58] sm:$0xff]  ;;  %v660_v47 = vpack.c.bf16 %v320_v46, %v319_v45  ;;  %p834_p12 = por %p833_p9, %p832_p7 }
  0x74   : > { %625 = vmatpush3.bf16.msra.mxu0 %v624_v14  ;;  %647 = vmatprep.subr.bf16.mxu1 %v902_v0  ;;  %v657_v44 = vpack.c.bf16 %v318_v43, %v317_v42  ;;  %v321_v48 = vld [vmem:[#allocation7 + $0x70] sm:$0xff]  ;;  %v322_v49 = vld [vmem:[#allocation7 + $0x78] sm:$0xff] }
  0x75   : > { %626 = vmatprep.subr.bf16.mxu0 %v902_v0  ;;  %v663_v50 = vpack.c.bf16 %v322_v49, %v321_v48  ;;  %p835_p2 = pnand %p834_p12, %p828_p3 }
  0x77   : > { %649 = vmatpush3.bf16.msra.mxu1 %v648_v24 }
  0x78   : > { %628 = vmatpush3.bf16.msra.mxu0 %v627_v21  ;;  %650 = vmatprep.subr.bf16.mxu1 %v902_v0 }
  0x79   : > { %629 = vmatprep.subr.bf16.mxu0 %v902_v0 }
  0x7b   : > { %652 = vmatpush3.bf16.msra.mxu1 %v651_v30 }
  0x7c   : > { %631 = vmatpush3.bf16.msra.mxu0 %v630_v27  ;;  %653 = vmatprep.subr.bf16.mxu1 %v902_v0 }
  0x7d   : > { %632 = vmatprep.subr.bf16.mxu0 %v902_v0 }
  0x7f   : > { %655 = vmatpush3.bf16.msra.mxu1 %v654_v41 }
  0x80   : > { %634 = vmatpush3.bf16.msra.mxu0 %v633_v31  ;;  %656 = vmatprep.subr.bf16.mxu1 %v902_v0 }
  0x81   : > { %635 = vmatprep.subr.bf16.mxu0 %v902_v0 }
  0x83   : > { %658 = vmatpush3.bf16.msra.mxu1 %v657_v44 }
  0x84   : > { %637 = vmatpush3.bf16.msra.mxu0 %v636_v34  ;;  %659 = vmatprep.subr.bf16.mxu1 %v902_v0 }
  0x85   : > { %638 = vmatprep.subr.bf16.mxu0 %v902_v0 }
  0x87   : > { %661 = vmatpush3.bf16.msra.mxu1 %v660_v47 }
  0x88   : > { %640 = vmatpush3.bf16.msra.mxu0 %v639_v37  ;;  %662 = vmatprep.subr.bf16.mxu1 %v902_v0 }
  0x8b   : > { %580 = vmatmul.mubr.f32.vlgmr.msra.gmra.mrb[0].mxu0 %v215_v38  ;;  %664 = vmatpush3.bf16.msra.mxu1 %v663_v50 }
 0x15e   : > { %v298_v51 = vpop.f32.mrb[0].mxu0 }
 0x15f   : > { %v303_v52 = vmul.f32 0.70710677, %v298_v51  ;;  %v581_v53 = vpop.f32.mrb[1].mxu0  ;;  %v302_v55 = vmul.f32 0.5, %v298_v51 }
 0x161   : > { %737 = verf.f32 %v303_v52 }
 0x16b   : > { %v738_v54 = vpop.eup %737 }
 0x16c   : > { %v305_v56 = vadd.f32 1.0, %v738_v54 }
 0x16e   : > { %v306_v57 = vmul.f32 %v305_v56, %v302_v55 }
 0x170   : > { %615 = vmatmul.mubr.f32.vlgmr.msra.gmra.mrb[0].mxu1 %v306_v57 }
 0x243   : > { %v389_v58 = vpop.f32.mrb[0].mxu1 }
 0x244   : > { %393 = vst [vmem:[%s214_s18] sm:$0xff] %v389_v58  ;;  %v616_v59 = vpop.f32.mrb[1].mxu1 }
 0x245   : > { %838 = shalt.err (!%p835_p2)
}
 0x246   : > { %s839_s10 = scalar_lea.hbm %s1136_s27, 128  ;;  %s843_s7 = scalar_lea.hbm %s1181_s3, 256 }
 0x247   : > { %p840_p13 = scmp.ne.s32.totalorder %s1136_s27, %s839_s10  ;;  %p844_p4 = scmp.lt.u32.totalorder %s1136_s27, %s1181_s3 }
 0x248   : > { %p845_p5 = scmp.lt.u32.totalorder %s843_s7, %s839_s10  ;;  %p847_p11 = scmp.lt.u32.totalorder %s839_s10, %s1136_s27 }
 0x249   : > { %p841_p6 = pnand %p840_p13, %p1195_p0 }
 0x24a   : > { %p846_p8 = por %p845_p5, %p844_p4 }
 0x24b   : > { %p842_p10 = pneg %p841_p6 }
 0x24c   : > { %p848_p1 = por %p847_p11, %p846_p8 }
 0x24e   : > { %p849_p3 = pnand %p848_p1, %p842_p10 }
 0x250   : > { %852 = shalt.err (!%p849_p3)
}
 0x251   : > { %675 = dma.vmem_to_hbm [thread:$0]  (%p1195_p0), %s1131_s20, 128, %s1136_s27, %s395_s29  }
 0x252 PF: > { %s420_s28 = sand.u32 1, %s883_s12   ;;  %p1196_p7 = scmp.ne.s32.totalorder %s1186_s19, 0 }
 0x253   : > { %p1197_p9 = scmp.ge.s32.totalorder %s895_s15, 2  ;;  %s421_s22 = scalar_lea.sflag [#allocation4], %s420_s28 }
 0x255   : > { %p689_p12 = pnand %p1197_p9, %p1196_p7 }
 0x257   : > { %878 = dma.done.wait (!%p689_p12), %s421_s22, 128  }
 0x258   : > { %880 = vsyncadd (!%p689_p12), %s421_s22, 4294967168  ;;  %p17_p2 = scmp.ge.s32.totalorder %s1036_s4, 4   ;;  %s1198_s12 = smov %s887_s13 }
 0x259   : > { %s1199_s13 = smov %s891_s14  ;;  %s1200_s14 = smov %s1052_s9 }
 0x25a   : > { %s1201_s15 = smov %s1036_s4  ;;  %19 = sbr.rel (!%p17_p2) target bundleno = 6 (0x6), region = 85 }
 0x261   :  { %426 = vsyncpa [#allocation3], 1 }
 0x262   :  { %428 = vsyncpa [#allocation3 + $0x1], 1 }
 0x263   :  { %429 = vsyncpa [#allocation6], 1 }
 0x264   :  { %430 = vsyncpa [#allocation4], 1 }
 0x265   :  { %432 = vsyncpa [#allocation4 + $0x1], 1 }

</bundles_post_ra>
